<compile_context>
chip_gen: v7x
topology: tpu7x:2x2x1
jax: 0.10.0
libtpu: 0.0.40
codegen_flags: <defaults>
</compile_context>

<pallas_src>
import jax
import jax.numpy as jnp
from jax.experimental import pallas as pl
from jax.experimental.pallas import tpu as pltpu


def _round_up(x: int, m: int) -> int:
    return ((x + m - 1) // m) * m


def _expert_embed_kernel(idx_ref, table_ref, o_ref, buf_ref, sem_ref):
    # idx_ref:   (B_pad,) int32 in SMEM (scalar-prefetched expert ids)
    # table_ref: (N, D) in HBM (memory_space=pl.ANY) - gathered row-by-row
    # o_ref:     (TB, D) output block in VMEM
    # buf_ref:   (TB, D) VMEM scratch holding the gathered rows
    # sem_ref:   (TB,)  DMA completion semaphores
    tb = buf_ref.shape[0]                      # static Python int
    base = pl.program_id(0) * tb

    # Issue all row-gather DMAs for this batch tile (HBM row -> VMEM row).
    for r in range(tb):
        row = idx_ref[base + r]                # cheap SMEM scalar read
        pltpu.make_async_copy(
            table_ref.at[pl.ds(row, 1), :],
            buf_ref.at[pl.ds(r, 1), :],
            sem_ref.at[r],
        ).start()

    # Wait for all gathers to land before touching the buffer.
    for r in range(tb):
        pltpu.make_async_copy(
            table_ref.at[pl.ds(0, 1), :],      # shape-only placeholder for wait
            buf_ref.at[pl.ds(r, 1), :],
            sem_ref.at[r],
        ).wait()

    # F.normalize(p=2, dim=1): x / max(||x||_2, 1e-12)
    #   == x * rsqrt(max(sum(x^2), 1e-24))     (rsqrt -> EUP, no divide)
    emb = buf_ref[...].astype(jnp.float32)
    sq = jnp.sum(emb * emb, axis=-1, keepdims=True)
    inv = jax.lax.rsqrt(jnp.maximum(sq, 1e-24))
    o_ref[...] = (emb * inv).astype(o_ref.dtype)


def expert_embeddings_forward(table, indices, *, block_b=64):
    """table: [num_experts, D] embedding table; indices: [B] int expert ids."""
    N, D = table.shape
    B = int(indices.shape[0])

    # PyTorch raises on out-of-range ids; here we clamp (jnp.take semantics) so
    # the row-gather DMA never walks outside the table. Validate ids on host.
    idx = jnp.clip(indices.astype(jnp.int32), 0, N - 1)

    # Batch tile: multiple of 8 sublanes; keep >= 2 grid steps when possible so
    # v7x's two TensorCores both participate; cap at block_b (the per-row DMA
    # issue/wait loops are statically unrolled in the kernel body).
    TB = max(8, min(block_b, _round_up(max(1, (B + 1) // 2), 8)))
    B_pad = _round_up(B, TB)
    if B_pad != B:
        idx = jnp.concatenate([idx, jnp.zeros((B_pad - B,), jnp.int32)])
    grid = (B_pad // TB,)

    cost = pl.CostEstimate(
        flops=3 * B_pad * D,                    # square + sum + scale
        transcendentals=B_pad,                  # one rsqrt per row
        bytes_accessed=8 * B_pad * D + 4 * B_pad,
    )

    out = pl.pallas_call(
        _expert_embed_kernel,
        out_shape=jax.ShapeDtypeStruct((B_pad, D), table.dtype),
        grid_spec=pltpu.PrefetchScalarGridSpec(
            num_scalar_prefetch=1,
            grid=grid,
            in_specs=[pl.BlockSpec(memory_space=pl.ANY)],   # table stays in HBM
            out_specs=pl.BlockSpec((TB, D), lambda i, idx_ref: (i, 0)),
            scratch_shapes=[
                pltpu.VMEM((TB, D), table.dtype),
                pltpu.SemaphoreType.DMA((TB,)),
            ],
        ),
        compiler_params=pltpu.CompilerParams(
            dimension_semantics=("parallel",)),
        cost_estimate=cost,
    )(idx, table)
    return out[:B]


def _reference(table, indices):
    emb = table[indices]
    norm = jnp.sqrt(jnp.sum(emb * emb, axis=1, keepdims=True))
    return emb / jnp.maximum(norm, 1e-12)


if __name__ == "__main__":
    # TODO(synk): model_names.index(expert_name) is host-side Python string
    # lookup (same as in PyTorch); it has no in-kernel equivalent and is done
    # in the wrapper before calling the kernel.
    model_names = [f"expert_{i}" for i in range(8)]   # 8 experts
    D = 256                                           # embedding dimension
    B = 16                                            # queried experts (batch)

    key = jax.random.PRNGKey(0)
    k_table, k_sel = jax.random.split(key)

    # nn.Embedding default init ~ N(0, 1).
    table = jax.random.normal(k_table, (len(model_names), D), dtype=jnp.float32)

    # Deterministic batch of expert-name queries, then name -> index mapping.
    sel = jax.random.randint(k_sel, (B,), 0, len(model_names))
    experts = [model_names[int(i)] for i in sel]
    indices = jnp.asarray([model_names.index(e) for e in experts], dtype=jnp.int32)

    # B=16 -> TB=8 -> grid=(2,): the batch pipeline / megacore split is exercised.
    out = expert_embeddings_forward(table, indices)
    out = jax.block_until_ready(out)

    ref = _reference(table, indices)
    assert out.shape == (B, D)
    assert jnp.allclose(out, ref, atol=1e-5, rtol=1e-5), "mismatch vs reference"

    print("KERNEL_OK")
</pallas_src>

<mosaic_0001>
module attributes {stable_mosaic.version = 11 : i64} {
  func.func @_expert_embed_kernel(%arg0: i32, %arg1: memref<16xi32, #tpu.memory_space<smem>>, %arg2: memref<8x256xf32, #tpu.memory_space<any>>, %arg3: memref<8x256xf32, #tpu.memory_space<vmem>>, %arg4: memref<8x256xf32, #tpu.memory_space<vmem>>, %arg5: memref<8x!tpu.dma_semaphore, #tpu.memory_space<semaphore_mem>>) attributes {dimension_semantics = [#tpu.dimension_semantics<parallel>], iteration_bounds = array<i64: 2>, scalar_prefetch = 1 : i64, scratch_operands = 2 : i64, tpu.core_type = #tpu.core_type<tc>, window_params = [{}, {transform_indices = @transform_1, window_bounds = array<i64: 8, 256>}]} {
    %c8_i32 = arith.constant 8 : i32
    %0 = arith.muli %arg0, %c8_i32 : i32
    %c0_i32 = arith.constant 0 : i32
    %1 = arith.addi %0, %c0_i32 : i32
    %2 = arith.index_cast %1 : i32 to index
    %3 = memref.load %arg1[%2] : memref<16xi32, #tpu.memory_space<smem>>
    %c0_i32_0 = arith.constant 0 : i32
    %c0_i32_1 = arith.constant 0 : i32
    %4 = tpu.memref_slice %arg2[%3, %c0_i32_1] : memref<8x256xf32, #tpu.memory_space<any>> -> memref<1x256xf32, #tpu.memory_space<any>>
    %c0_i32_2 = arith.constant 0 : i32
    %c0_i32_3 = arith.constant 0 : i32
    %5 = tpu.memref_slice %arg4[%c0_i32_2, %c0_i32_3] : memref<8x256xf32, #tpu.memory_space<vmem>> -> memref<1x256xf32, #tpu.memory_space<vmem>>
    %6 = tpu.memref_slice %arg5[%c0_i32_0] : memref<8x!tpu.dma_semaphore, #tpu.memory_space<semaphore_mem>> -> memref<1x!tpu.dma_semaphore, #tpu.memory_space<semaphore_mem>>
    %7 = tpu.memref_squeeze %6 : memref<1x!tpu.dma_semaphore, #tpu.memory_space<semaphore_mem>> -> memref<!tpu.dma_semaphore, #tpu.memory_space<semaphore_mem>>
    tpu.enqueue_dma source(%4 : memref<1x256xf32, #tpu.memory_space<any>>) target(%5 : memref<1x256xf32, #tpu.memory_space<vmem>>) target_semaphore(%7 : memref<!tpu.dma_semaphore, #tpu.memory_space<semaphore_mem>>)
    %c1_i32 = arith.constant 1 : i32
    %8 = arith.addi %0, %c1_i32 : i32
    %9 = arith.index_cast %8 : i32 to index
    %10 = memref.load %arg1[%9] : memref<16xi32, #tpu.memory_space<smem>>
    %c1_i32_4 = arith.constant 1 : i32
    %c0_i32_5 = arith.constant 0 : i32
    %11 = tpu.memref_slice %arg2[%10, %c0_i32_5] : memref<8x256xf32, #tpu.memory_space<any>> -> memref<1x256xf32, #tpu.memory_space<any>>
    %c1_i32_6 = arith.constant 1 : i32
    %c0_i32_7 = arith.constant 0 : i32
    %12 = tpu.memref_slice %arg4[%c1_i32_6, %c0_i32_7] : memref<8x256xf32, #tpu.memory_space<vmem>> -> memref<1x256xf32, #tpu.memory_space<vmem>>
    %13 = tpu.memref_slice %arg5[%c1_i32_4] : memref<8x!tpu.dma_semaphore, #tpu.memory_space<semaphore_mem>> -> memref<1x!tpu.dma_semaphore, #tpu.memory_space<semaphore_mem>>
    %14 = tpu.memref_squeeze %13 : memref<1x!tpu.dma_semaphore, #tpu.memory_space<semaphore_mem>> -> memref<!tpu.dma_semaphore, #tpu.memory_space<semaphore_mem>>
    tpu.enqueue_dma source(%11 : memref<1x256xf32, #tpu.memory_space<any>>) target(%12 : memref<1x256xf32, #tpu.memory_space<vmem>>) target_semaphore(%14 : memref<!tpu.dma_semaphore, #tpu.memory_space<semaphore_mem>>)
    %c2_i32 = arith.constant 2 : i32
    %15 = arith.addi %0, %c2_i32 : i32
    %16 = arith.index_cast %15 : i32 to index
    %17 = memref.load %arg1[%16] : memref<16xi32, #tpu.memory_space<smem>>
    %c2_i32_8 = arith.constant 2 : i32
    %c0_i32_9 = arith.constant 0 : i32
    %18 = tpu.memref_slice %arg2[%17, %c0_i32_9] : memref<8x256xf32, #tpu.memory_space<any>> -> memref<1x256xf32, #tpu.memory_space<any>>
    %c2_i32_10 = arith.constant 2 : i32
    %c0_i32_11 = arith.constant 0 : i32
    %19 = tpu.memref_slice %arg4[%c2_i32_10, %c0_i32_11] : memref<8x256xf32, #tpu.memory_space<vmem>> -> memref<1x256xf32, #tpu.memory_space<vmem>>
    %20 = tpu.memref_slice %arg5[%c2_i32_8] : memref<8x!tpu.dma_semaphore, #tpu.memory_space<semaphore_mem>> -> memref<1x!tpu.dma_semaphore, #tpu.memory_space<semaphore_mem>>
    %21 = tpu.memref_squeeze %20 : memref<1x!tpu.dma_semaphore, #tpu.memory_space<semaphore_mem>> -> memref<!tpu.dma_semaphore, #tpu.memory_space<semaphore_mem>>
    tpu.enqueue_dma source(%18 : memref<1x256xf32, #tpu.memory_space<any>>) target(%19 : memref<1x256xf32, #tpu.memory_space<vmem>>) target_semaphore(%21 : memref<!tpu.dma_semaphore, #tpu.memory_space<semaphore_mem>>)
    %c3_i32 = arith.constant 3 : i32
    %22 = arith.addi %0, %c3_i32 : i32
    %23 = arith.index_cast %22 : i32 to index
    %24 = memref.load %arg1[%23] : memref<16xi32, #tpu.memory_space<smem>>
    %c3_i32_12 = arith.constant 3 : i32
    %c0_i32_13 = arith.constant 0 : i32
    %25 = tpu.memref_slice %arg2[%24, %c0_i32_13] : memref<8x256xf32, #tpu.memory_space<any>> -> memref<1x256xf32, #tpu.memory_space<any>>
    %c3_i32_14 = arith.constant 3 : i32
    %c0_i32_15 = arith.constant 0 : i32
    %26 = tpu.memref_slice %arg4[%c3_i32_14, %c0_i32_15] : memref<8x256xf32, #tpu.memory_space<vmem>> -> memref<1x256xf32, #tpu.memory_space<vmem>>
    %27 = tpu.memref_slice %arg5[%c3_i32_12] : memref<8x!tpu.dma_semaphore, #tpu.memory_space<semaphore_mem>> -> memref<1x!tpu.dma_semaphore, #tpu.memory_space<semaphore_mem>>
    %28 = tpu.memref_squeeze %27 : memref<1x!tpu.dma_semaphore, #tpu.memory_space<semaphore_mem>> -> memref<!tpu.dma_semaphore, #tpu.memory_space<semaphore_mem>>
    tpu.enqueue_dma source(%25 : memref<1x256xf32, #tpu.memory_space<any>>) target(%26 : memref<1x256xf32, #tpu.memory_space<vmem>>) target_semaphore(%28 : memref<!tpu.dma_semaphore, #tpu.memory_space<semaphore_mem>>)
    %c4_i32 = arith.constant 4 : i32
    %29 = arith.addi %0, %c4_i32 : i32
    %30 = arith.index_cast %29 : i32 to index
    %31 = memref.load %arg1[%30] : memref<16xi32, #tpu.memory_space<smem>>
    %c4_i32_16 = arith.constant 4 : i32
    %c0_i32_17 = arith.constant 0 : i32
    %32 = tpu.memref_slice %arg2[%31, %c0_i32_17] : memref<8x256xf32, #tpu.memory_space<any>> -> memref<1x256xf32, #tpu.memory_space<any>>
    %c4_i32_18 = arith.constant 4 : i32
    %c0_i32_19 = arith.constant 0 : i32
    %33 = tpu.memref_slice %arg4[%c4_i32_18, %c0_i32_19] : memref<8x256xf32, #tpu.memory_space<vmem>> -> memref<1x256xf32, #tpu.memory_space<vmem>>
    %34 = tpu.memref_slice %arg5[%c4_i32_16] : memref<8x!tpu.dma_semaphore, #tpu.memory_space<semaphore_mem>> -> memref<1x!tpu.dma_semaphore, #tpu.memory_space<semaphore_mem>>
    %35 = tpu.memref_squeeze %34 : memref<1x!tpu.dma_semaphore, #tpu.memory_space<semaphore_mem>> -> memref<!tpu.dma_semaphore, #tpu.memory_space<semaphore_mem>>
    tpu.enqueue_dma source(%32 : memref<1x256xf32, #tpu.memory_space<any>>) target(%33 : memref<1x256xf32, #tpu.memory_space<vmem>>) target_semaphore(%35 : memref<!tpu.dma_semaphore, #tpu.memory_space<semaphore_mem>>)
    %c5_i32 = arith.constant 5 : i32
    %36 = arith.addi %0, %c5_i32 : i32
    %37 = arith.index_cast %36 : i32 to index
    %38 = memref.load %arg1[%37] : memref<16xi32, #tpu.memory_space<smem>>
    %c5_i32_20 = arith.constant 5 : i32
    %c0_i32_21 = arith.constant 0 : i32
    %39 = tpu.memref_slice %arg2[%38, %c0_i32_21] : memref<8x256xf32, #tpu.memory_space<any>> -> memref<1x256xf32, #tpu.memory_space<any>>
    %c5_i32_22 = arith.constant 5 : i32
    %c0_i32_23 = arith.constant 0 : i32
    %40 = tpu.memref_slice %arg4[%c5_i32_22, %c0_i32_23] : memref<8x256xf32, #tpu.memory_space<vmem>> -> memref<1x256xf32, #tpu.memory_space<vmem>>
    %41 = tpu.memref_slice %arg5[%c5_i32_20] : memref<8x!tpu.dma_semaphore, #tpu.memory_space<semaphore_mem>> -> memref<1x!tpu.dma_semaphore, #tpu.memory_space<semaphore_mem>>
    %42 = tpu.memref_squeeze %41 : memref<1x!tpu.dma_semaphore, #tpu.memory_space<semaphore_mem>> -> memref<!tpu.dma_semaphore, #tpu.memory_space<semaphore_mem>>
    tpu.enqueue_dma source(%39 : memref<1x256xf32, #tpu.memory_space<any>>) target(%40 : memref<1x256xf32, #tpu.memory_space<vmem>>) target_semaphore(%42 : memref<!tpu.dma_semaphore, #tpu.memory_space<semaphore_mem>>)
    %c6_i32 = arith.constant 6 : i32
    %43 = arith.addi %0, %c6_i32 : i32
    %44 = arith.index_cast %43 : i32 to index
    %45 = memref.load %arg1[%44] : memref<16xi32, #tpu.memory_space<smem>>
    %c6_i32_24 = arith.constant 6 : i32
    %c0_i32_25 = arith.constant 0 : i32
    %46 = tpu.memref_slice %arg2[%45, %c0_i32_25] : memref<8x256xf32, #tpu.memory_space<any>> -> memref<1x256xf32, #tpu.memory_space<any>>
    %c6_i32_26 = arith.constant 6 : i32
    %c0_i32_27 = arith.constant 0 : i32
    %47 = tpu.memref_slice %arg4[%c6_i32_26, %c0_i32_27] : memref<8x256xf32, #tpu.memory_space<vmem>> -> memref<1x256xf32, #tpu.memory_space<vmem>>
    %48 = tpu.memref_slice %arg5[%c6_i32_24] : memref<8x!tpu.dma_semaphore, #tpu.memory_space<semaphore_mem>> -> memref<1x!tpu.dma_semaphore, #tpu.memory_space<semaphore_mem>>
    %49 = tpu.memref_squeeze %48 : memref<1x!tpu.dma_semaphore, #tpu.memory_space<semaphore_mem>> -> memref<!tpu.dma_semaphore, #tpu.memory_space<semaphore_mem>>
    tpu.enqueue_dma source(%46 : memref<1x256xf32, #tpu.memory_space<any>>) target(%47 : memref<1x256xf32, #tpu.memory_space<vmem>>) target_semaphore(%49 : memref<!tpu.dma_semaphore, #tpu.memory_space<semaphore_mem>>)
    %c7_i32 = arith.constant 7 : i32
    %50 = arith.addi %0, %c7_i32 : i32
    %51 = arith.index_cast %50 : i32 to index
    %52 = memref.load %arg1[%51] : memref<16xi32, #tpu.memory_space<smem>>
    %c7_i32_28 = arith.constant 7 : i32
    %c0_i32_29 = arith.constant 0 : i32
    %53 = tpu.memref_slice %arg2[%52, %c0_i32_29] : memref<8x256xf32, #tpu.memory_space<any>> -> memref<1x256xf32, #tpu.memory_space<any>>
    %c7_i32_30 = arith.constant 7 : i32
    %c0_i32_31 = arith.constant 0 : i32
    %54 = tpu.memref_slice %arg4[%c7_i32_30, %c0_i32_31] : memref<8x256xf32, #tpu.memory_space<vmem>> -> memref<1x256xf32, #tpu.memory_space<vmem>>
    %55 = tpu.memref_slice %arg5[%c7_i32_28] : memref<8x!tpu.dma_semaphore, #tpu.memory_space<semaphore_mem>> -> memref<1x!tpu.dma_semaphore, #tpu.memory_space<semaphore_mem>>
    %56 = tpu.memref_squeeze %55 : memref<1x!tpu.dma_semaphore, #tpu.memory_space<semaphore_mem>> -> memref<!tpu.dma_semaphore, #tpu.memory_space<semaphore_mem>>
    tpu.enqueue_dma source(%53 : memref<1x256xf32, #tpu.memory_space<any>>) target(%54 : memref<1x256xf32, #tpu.memory_space<vmem>>) target_semaphore(%56 : memref<!tpu.dma_semaphore, #tpu.memory_space<semaphore_mem>>)
    %c0_i32_32 = arith.constant 0 : i32
    %c0_i32_33 = arith.constant 0 : i32
    %c0_i32_34 = arith.constant 0 : i32
    %57 = tpu.memref_slice %arg2[%c0_i32_33, %c0_i32_34] : memref<8x256xf32, #tpu.memory_space<any>> -> memref<1x256xf32, #tpu.memory_space<any>>
    %c0_i32_35 = arith.constant 0 : i32
    %c0_i32_36 = arith.constant 0 : i32
    %58 = tpu.memref_slice %arg4[%c0_i32_35, %c0_i32_36] : memref<8x256xf32, #tpu.memory_space<vmem>> -> memref<1x256xf32, #tpu.memory_space<vmem>>
    %59 = tpu.memref_slice %arg5[%c0_i32_32] : memref<8x!tpu.dma_semaphore, #tpu.memory_space<semaphore_mem>> -> memref<1x!tpu.dma_semaphore, #tpu.memory_space<semaphore_mem>>
    %60 = tpu.memref_squeeze %59 : memref<1x!tpu.dma_semaphore, #tpu.memory_space<semaphore_mem>> -> memref<!tpu.dma_semaphore, #tpu.memory_space<semaphore_mem>>
    tpu.wait_dma2 semaphore(%60 : memref<!tpu.dma_semaphore, #tpu.memory_space<semaphore_mem>>) src(%57 : memref<1x256xf32, #tpu.memory_space<any>>) dst(%58 : memref<1x256xf32, #tpu.memory_space<vmem>>)
    %c1_i32_37 = arith.constant 1 : i32
    %c0_i32_38 = arith.constant 0 : i32
    %c0_i32_39 = arith.constant 0 : i32
    %61 = tpu.memref_slice %arg2[%c0_i32_38, %c0_i32_39] : memref<8x256xf32, #tpu.memory_space<any>> -> memref<1x256xf32, #tpu.memory_space<any>>
    %c1_i32_40 = arith.constant 1 : i32
    %c0_i32_41 = arith.constant 0 : i32
    %62 = tpu.memref_slice %arg4[%c1_i32_40, %c0_i32_41] : memref<8x256xf32, #tpu.memory_space<vmem>> -> memref<1x256xf32, #tpu.memory_space<vmem>>
    %63 = tpu.memref_slice %arg5[%c1_i32_37] : memref<8x!tpu.dma_semaphore, #tpu.memory_space<semaphore_mem>> -> memref<1x!tpu.dma_semaphore, #tpu.memory_space<semaphore_mem>>
    %64 = tpu.memref_squeeze %63 : memref<1x!tpu.dma_semaphore, #tpu.memory_space<semaphore_mem>> -> memref<!tpu.dma_semaphore, #tpu.memory_space<semaphore_mem>>
    tpu.wait_dma2 semaphore(%64 : memref<!tpu.dma_semaphore, #tpu.memory_space<semaphore_mem>>) src(%61 : memref<1x256xf32, #tpu.memory_space<any>>) dst(%62 : memref<1x256xf32, #tpu.memory_space<vmem>>)
    %c2_i32_42 = arith.constant 2 : i32
    %c0_i32_43 = arith.constant 0 : i32
    %c0_i32_44 = arith.constant 0 : i32
    %65 = tpu.memref_slice %arg2[%c0_i32_43, %c0_i32_44] : memref<8x256xf32, #tpu.memory_space<any>> -> memref<1x256xf32, #tpu.memory_space<any>>
    %c2_i32_45 = arith.constant 2 : i32
    %c0_i32_46 = arith.constant 0 : i32
    %66 = tpu.memref_slice %arg4[%c2_i32_45, %c0_i32_46] : memref<8x256xf32, #tpu.memory_space<vmem>> -> memref<1x256xf32, #tpu.memory_space<vmem>>
    %67 = tpu.memref_slice %arg5[%c2_i32_42] : memref<8x!tpu.dma_semaphore, #tpu.memory_space<semaphore_mem>> -> memref<1x!tpu.dma_semaphore, #tpu.memory_space<semaphore_mem>>
    %68 = tpu.memref_squeeze %67 : memref<1x!tpu.dma_semaphore, #tpu.memory_space<semaphore_mem>> -> memref<!tpu.dma_semaphore, #tpu.memory_space<semaphore_mem>>
    tpu.wait_dma2 semaphore(%68 : memref<!tpu.dma_semaphore, #tpu.memory_space<semaphore_mem>>) src(%65 : memref<1x256xf32, #tpu.memory_space<any>>) dst(%66 : memref<1x256xf32, #tpu.memory_space<vmem>>)
    %c3_i32_47 = arith.constant 3 : i32
    %c0_i32_48 = arith.constant 0 : i32
    %c0_i32_49 = arith.constant 0 : i32
    %69 = tpu.memref_slice %arg2[%c0_i32_48, %c0_i32_49] : memref<8x256xf32, #tpu.memory_space<any>> -> memref<1x256xf32, #tpu.memory_space<any>>
    %c3_i32_50 = arith.constant 3 : i32
    %c0_i32_51 = arith.constant 0 : i32
    %70 = tpu.memref_slice %arg4[%c3_i32_50, %c0_i32_51] : memref<8x256xf32, #tpu.memory_space<vmem>> -> memref<1x256xf32, #tpu.memory_space<vmem>>
    %71 = tpu.memref_slice %arg5[%c3_i32_47] : memref<8x!tpu.dma_semaphore, #tpu.memory_space<semaphore_mem>> -> memref<1x!tpu.dma_semaphore, #tpu.memory_space<semaphore_mem>>
    %72 = tpu.memref_squeeze %71 : memref<1x!tpu.dma_semaphore, #tpu.memory_space<semaphore_mem>> -> memref<!tpu.dma_semaphore, #tpu.memory_space<semaphore_mem>>
    tpu.wait_dma2 semaphore(%72 : memref<!tpu.dma_semaphore, #tpu.memory_space<semaphore_mem>>) src(%69 : memref<1x256xf32, #tpu.memory_space<any>>) dst(%70 : memref<1x256xf32, #tpu.memory_space<vmem>>)
    %c4_i32_52 = arith.constant 4 : i32
    %c0_i32_53 = arith.constant 0 : i32
    %c0_i32_54 = arith.constant 0 : i32
    %73 = tpu.memref_slice %arg2[%c0_i32_53, %c0_i32_54] : memref<8x256xf32, #tpu.memory_space<any>> -> memref<1x256xf32, #tpu.memory_space<any>>
    %c4_i32_55 = arith.constant 4 : i32
    %c0_i32_56 = arith.constant 0 : i32
    %74 = tpu.memref_slice %arg4[%c4_i32_55, %c0_i32_56] : memref<8x256xf32, #tpu.memory_space<vmem>> -> memref<1x256xf32, #tpu.memory_space<vmem>>
    %75 = tpu.memref_slice %arg5[%c4_i32_52] : memref<8x!tpu.dma_semaphore, #tpu.memory_space<semaphore_mem>> -> memref<1x!tpu.dma_semaphore, #tpu.memory_space<semaphore_mem>>
    %76 = tpu.memref_squeeze %75 : memref<1x!tpu.dma_semaphore, #tpu.memory_space<semaphore_mem>> -> memref<!tpu.dma_semaphore, #tpu.memory_space<semaphore_mem>>
    tpu.wait_dma2 semaphore(%76 : memref<!tpu.dma_semaphore, #tpu.memory_space<semaphore_mem>>) src(%73 : memref<1x256xf32, #tpu.memory_space<any>>) dst(%74 : memref<1x256xf32, #tpu.memory_space<vmem>>)
    %c5_i32_57 = arith.constant 5 : i32
    %c0_i32_58 = arith.constant 0 : i32
    %c0_i32_59 = arith.constant 0 : i32
    %77 = tpu.memref_slice %arg2[%c0_i32_58, %c0_i32_59] : memref<8x256xf32, #tpu.memory_space<any>> -> memref<1x256xf32, #tpu.memory_space<any>>
    %c5_i32_60 = arith.constant 5 : i32
    %c0_i32_61 = arith.constant 0 : i32
    %78 = tpu.memref_slice %arg4[%c5_i32_60, %c0_i32_61] : memref<8x256xf32, #tpu.memory_space<vmem>> -> memref<1x256xf32, #tpu.memory_space<vmem>>
    %79 = tpu.memref_slice %arg5[%c5_i32_57] : memref<8x!tpu.dma_semaphore, #tpu.memory_space<semaphore_mem>> -> memref<1x!tpu.dma_semaphore, #tpu.memory_space<semaphore_mem>>
    %80 = tpu.memref_squeeze %79 : memref<1x!tpu.dma_semaphore, #tpu.memory_space<semaphore_mem>> -> memref<!tpu.dma_semaphore, #tpu.memory_space<semaphore_mem>>
    tpu.wait_dma2 semaphore(%80 : memref<!tpu.dma_semaphore, #tpu.memory_space<semaphore_mem>>) src(%77 : memref<1x256xf32, #tpu.memory_space<any>>) dst(%78 : memref<1x256xf32, #tpu.memory_space<vmem>>)
    %c6_i32_62 = arith.constant 6 : i32
    %c0_i32_63 = arith.constant 0 : i32
    %c0_i32_64 = arith.constant 0 : i32
    %81 = tpu.memref_slice %arg2[%c0_i32_63, %c0_i32_64] : memref<8x256xf32, #tpu.memory_space<any>> -> memref<1x256xf32, #tpu.memory_space<any>>
    %c6_i32_65 = arith.constant 6 : i32
    %c0_i32_66 = arith.constant 0 : i32
    %82 = tpu.memref_slice %arg4[%c6_i32_65, %c0_i32_66] : memref<8x256xf32, #tpu.memory_space<vmem>> -> memref<1x256xf32, #tpu.memory_space<vmem>>
    %83 = tpu.memref_slice %arg5[%c6_i32_62] : memref<8x!tpu.dma_semaphore, #tpu.memory_space<semaphore_mem>> -> memref<1x!tpu.dma_semaphore, #tpu.memory_space<semaphore_mem>>
    %84 = tpu.memref_squeeze %83 : memref<1x!tpu.dma_semaphore, #tpu.memory_space<semaphore_mem>> -> memref<!tpu.dma_semaphore, #tpu.memory_space<semaphore_mem>>
    tpu.wait_dma2 semaphore(%84 : memref<!tpu.dma_semaphore, #tpu.memory_space<semaphore_mem>>) src(%81 : memref<1x256xf32, #tpu.memory_space<any>>) dst(%82 : memref<1x256xf32, #tpu.memory_space<vmem>>)
    %c7_i32_67 = arith.constant 7 : i32
    %c0_i32_68 = arith.constant 0 : i32
    %c0_i32_69 = arith.constant 0 : i32
    %85 = tpu.memref_slice %arg2[%c0_i32_68, %c0_i32_69] : memref<8x256xf32, #tpu.memory_space<any>> -> memref<1x256xf32, #tpu.memory_space<any>>
    %c7_i32_70 = arith.constant 7 : i32
    %c0_i32_71 = arith.constant 0 : i32
    %86 = tpu.memref_slice %arg4[%c7_i32_70, %c0_i32_71] : memref<8x256xf32, #tpu.memory_space<vmem>> -> memref<1x256xf32, #tpu.memory_space<vmem>>
    %87 = tpu.memref_slice %arg5[%c7_i32_67] : memref<8x!tpu.dma_semaphore, #tpu.memory_space<semaphore_mem>> -> memref<1x!tpu.dma_semaphore, #tpu.memory_space<semaphore_mem>>
    %88 = tpu.memref_squeeze %87 : memref<1x!tpu.dma_semaphore, #tpu.memory_space<semaphore_mem>> -> memref<!tpu.dma_semaphore, #tpu.memory_space<semaphore_mem>>
    tpu.wait_dma2 semaphore(%88 : memref<!tpu.dma_semaphore, #tpu.memory_space<semaphore_mem>>) src(%85 : memref<1x256xf32, #tpu.memory_space<any>>) dst(%86 : memref<1x256xf32, #tpu.memory_space<vmem>>)
    %c0 = arith.constant 0 : index
    %c0_72 = arith.constant 0 : index
    %89 = vector.load %arg4[%c0, %c0_72] : memref<8x256xf32, #tpu.memory_space<vmem>>, vector<8x256xf32>
    %90 = arith.mulf %89, %89 : vector<8x256xf32>
    %cst = arith.constant dense<0.000000e+00> : vector<8xf32>
    %91 = vector.multi_reduction <add>, %90, %cst [1] : vector<8x256xf32> to vector<8xf32>
    %92 = vector.shape_cast %91 : vector<8xf32> to vector<8x1xf32>
    %cst_73 = arith.constant 1.000000e-24 : f32
    %93 = vector.broadcast %cst_73 : f32 to vector<8x1xf32>
    %94 = arith.maximumf %92, %93 : vector<8x1xf32>
    %95 = math.rsqrt %94 : vector<8x1xf32>
    %96 = vector.broadcast %95 : vector<8x1xf32> to vector<8x256xf32>
    %97 = arith.mulf %89, %96 : vector<8x256xf32>
    %c0_74 = arith.constant 0 : index
    %c0_75 = arith.constant 0 : index
    %98 = vector.load %arg3[%c0_74, %c0_75] : memref<8x256xf32, #tpu.memory_space<vmem>>, vector<8x256xf32>
    tpu.vector_store %arg3[%c0_74, %c0_75], %97 {strides = array<i32>} : memref<8x256xf32, #tpu.memory_space<vmem>>, vector<8x256xf32>,
    return
  }
  func.func @transform_1(%arg0: i32, %arg1: memref<16xi32, #tpu.memory_space<smem>>) -> (i32, i32) {
    %c0_i32 = arith.constant 0 : i32
    %c0_i32_0 = arith.constant 0 : i32
    return %arg0, %c0_i32 : i32, i32
  }
}

</mosaic_0001>

<bundles_post_ra>
// kernel: tpu_custom_call.1
= control target key start
LH: loop header
LB: loop body
LE: loop exit
PB: predicated region body
PF: predicated region fallthrough
CT: control target
= control target key end

     0   :  { %s1007_s0 = inlined_call_operand.hbm [shape: s32[16], index: 0, kind: input, shape index: {}]   ;;  %s1008_s1 = inlined_call_operand.hbm [shape: f32[8,256], index: 1, kind: input, shape index: {}]   ;;  %s1009_s2 = inlined_call_operand.hbm [shape: f32[16,256], index: 2, kind: output, shape index: {}]  }
   0x1   :  { %s424_s11 = scalar_lea.hbm %s1007_s0, 16 }
   0x2   :  { %p425_p0 = scmp.ne.s32.totalorder %s1007_s0, %s424_s11  ;;  %p428_p1 = scmp.lt.u32.totalorder %s424_s11, %s1007_s0 }
   0x4   :  { %p430_p2 = pnand %p428_p1, %p425_p0 }
   0x6   :  { %433 = shalt.err (!%p430_p2)  }
   0x7   :  { %s700_s16 = smov [#allocation5]  }
   0x8   :  { %8 = dma.hbm_to_smem %s1007_s0, 16, %s700_s16, [#allocation4] }
   0x9   :  { %666 = dma.done.wait [#allocation4], 16 }
   0xa   :  { %667 = vsyncadd [#allocation4], 4294967280 }
   0xb   :  { %10 = sfence }
   0xc   :  { %11 = vsyncpa [#allocation7], 0 }
   0xd   :  { %13 = vsyncpa [#allocation7 + $0x1], 0  ;;  %s739_s19 = smov 0   ;;  %s741_s20 = smov 0  }
   0xe   :  { %s743_s21 = smov 0  }
   0xf LB: > { %1015 = sst [smem:[#allocation26_spill]] %s690_s19  ;;  %s345_s0 = sadd.s32 4294967295, %s698_s21   ;;  %s698_s21 = sphi %s743_s21, %s1024_s21   ;;  %s694_s20 = sphi %s741_s20, %s1027_s20   ;;  %s690_s19 = sphi %s739_s19, %s1026_s19  }
  0x10   : > { %s756_s22 = sadd.s32 1, %s698_s21   ;;  %s25_s24 = sadd.s32 1, %s694_s20 }
  0x11   : > { %1016 = sst [smem:[#allocation27_spill]] %s756_s22  ;;  %s22_s23 = ssub.s32 %s698_s21, %s756_s22 }
  0x12   : > { %p23_p3 = scmp.eq.s32.totalorder %s22_s23, 0  ;;  %p346_p4 = scmp.ne.s32.totalorder %s22_s23, 0 }
  0x13   : > { %p29_p5 = scmp.eq.s32.totalorder %s698_s21, 1  ;;  %p34_p6 = scmp.ne.s32.totalorder %s694_s20, %s690_s19 }
  0x14   : > { %s765_s25 = scalar_select %p23_p3, %s694_s20, %s25_s24  }
  0x15   : > { %p767_p7 = por %p346_p4, %p29_p5  ;;  %p35_p8 = scmp.eq.s32.totalorder %s345_s0, 1 }
  0x16   : > { %1017 = sst [smem:[#allocation28_spill]] %s765_s25  ;;  %p347_p10 = scmp.ge.s32.totalorder %s698_s21, 2 }
  0x17   : > { %p771_p9 = por %p35_p8, %p34_p6  ;;  %s1010_s28 = sand.u32 (!%p347_p10), 1, %s694_s20  }
  0x18   : > { %44 = sbr.rel (%p347_p10) target bundleno = 419 (0x1a3), region = 12  ;;  %s778_s29 = sshll.u32 (!%p347_p10), %s698_s21, 3 }
  0x19   : > { %s1019_s27 = scalar_select %p771_p9, 1, 0 }
  0x1a   : > { %s782_s30 = sshll.u32 (!%p347_p10), %s1010_s28, 4  ;;  %s53_s3 = sld [smem:[#allocation5 + %s778_s29]] (!%p347_p10) }
  0x1b   : > { %1020 = sst [smem:[#allocation29_spill]] %s1019_s27  ;;  %s701_s4 = smov (!%p347_p10), [#allocation2]  }
  0x1c   : > { %s61_s5 = sshll.u32 (!%p347_p10), %s701_s4, 4  ;;  %s65_s6 = sadd.s32 (!%p347_p10), 1, %s778_s29  ;;  %s785_s5 = int_to_ptr.vmem [resolvable:$true] %s61_s5 }
  0x1d   : > { %s788_s7 = sld [smem:[#allocation5 + %s65_s6]] (!%p347_p10)  ;;  %s702_s8 = smov (!%p347_p10), [#allocation2 + $0x1]  }
  0x1e   : > { %s76_s9 = sshll.u32 (!%p347_p10), %s702_s8, 4  ;;  %s80_s14 = sadd.s32 (!%p347_p10), 2, %s778_s29  ;;  %s790_s9 = int_to_ptr.vmem [resolvable:$true] %s76_s9 }
  0x1f   : > { %s793_s16 = sld [smem:[#allocation5 + %s80_s14]]  ;;  %s801_s6 = scalar_lea.hbm %s1008_s1, 256 }
  0x20   : > { %s54_s10 = sshrl.u32 %s53_s3, 3  ;;  %s55_s11 = sand.u32 7, %s53_s3  }
  0x21   : > { %s350_s12 = sshll.u32 %s54_s10, 4 }
  0x22   : > { %s57_s13 = sadd.s32 %s350_s12, %s55_s11 }
  0x23   : > { %s351_s15 = sshll.u32 %s57_s13, 4 }
  0x24   : > { %s59_s0 = scalar_lea.hbm %s1008_s1, %s351_s15 }
  0x25   : > { %s434_s23 = scalar_lea.hbm %s59_s0, 32  ;;  %p437_p12 = scmp.lt.u32.totalorder %s59_s0, %s1008_s1 }
  0x26   : > { %p435_p11 = scmp.ne.s32.totalorder %s59_s0, %s434_s23  ;;  %p438_p13 = scmp.lt.u32.totalorder %s801_s6, %s434_s23 }
  0x27   : > { %p440_p1 = scmp.lt.u32.totalorder %s434_s23, %s59_s0 }
  0x28   : > { %p439_p0 = por %p438_p13, %p437_p12 }
  0x2a   : > { %p441_p2 = por %p440_p1, %p439_p0 }
  0x2c   : > { %p442_p3 = pnand %p441_p2, %p435_p11 }
  0x2e   : > { %445 = shalt.err (!%p442_p3)  }
  0x2f   : > { %s446_s10 = scalar_lea.vmem %s785_s5, 32  ;;  %s810_s11 = scalar_lea.vmem %s785_s5, 256 }
  0x30   : > { %p447_p4 = scmp.ne.s32.totalorder %s785_s5, %s446_s10  ;;  %p451_p5 = scmp.lt.s32.totalorder %s785_s5, %s785_s5 }
  0x31   : > { %p452_p6 = scmp.lt.s32.totalorder %s810_s11, %s446_s10 }
  0x33   : > { %p453_p8 = por %p452_p6, %p451_p5 }
  0x35   : > { %p454_p10 = pnand %p453_p8, %p447_p4 }
  0x37   : > { %457 = shalt.err (!%p454_p10)  }
  0x38   : > { %s703_s12 = smov 128   ;;  %s704_s13 = smov 1  }
  0x39   : > { %64 = dma.hbm_to_vmem [thread:$0]  %s59_s0, 32, %s785_s5, [#allocation3], %s703_s12, %s703_s12, %s704_s13 }
  0x3a   : > { %s67_s14 = sshrl.u32 %s788_s7, 3  ;;  %s68_s15 = sand.u32 7, %s788_s7  }
  0x3b   : > { %s352_s17 = sshll.u32 %s67_s14, 4  ;;  %s705_s18 = smov [#allocation2 + $0x2]  }
  0x3c   : > { %s91_s23 = sshll.u32 %s705_s18, 4  ;;  %s70_s24 = sadd.s32 %s352_s17, %s68_s15  ;;  %s821_s23 = int_to_ptr.vmem [resolvable:$true] %s91_s23 }
  0x3d   : > { %s353_s4 = sshll.u32 %s70_s24, 4  ;;  %s82_s3 = sshrl.u32 %s793_s16, 3 }
  0x3e   : > { %s72_s28 = scalar_lea.hbm %s1008_s1, %s353_s4  ;;  %s83_s25 = sand.u32 7, %s793_s16  }
  0x3f   : > { %s458_s22 = scalar_lea.hbm %s72_s28, 32  ;;  %p461_p12 = scmp.lt.u32.totalorder %s72_s28, %s1008_s1 }
  0x40   : > { %p459_p11 = scmp.ne.s32.totalorder %s72_s28, %s458_s22  ;;  %p462_p13 = scmp.lt.u32.totalorder %s801_s6, %s458_s22 }
  0x41   : > { %p464_p1 = scmp.lt.u32.totalorder %s458_s22, %s72_s28 }
  0x42   : > { %p463_p0 = por %p462_p13, %p461_p12 }
  0x44   : > { %p465_p2 = por %p464_p1, %p463_p0 }
  0x46   : > { %p466_p3 = pnand %p465_p2, %p459_p11 }
  0x48   : > { %469 = shalt.err (!%p466_p3)  }
  0x49   : > { %s470_s7 = scalar_lea.vmem %s790_s9, 32  ;;  %p475_p5 = scmp.lt.s32.totalorder %s790_s9, %s785_s5 }
  0x4a   : > { %p471_p4 = scmp.ne.s32.totalorder %s790_s9, %s470_s7  ;;  %p476_p6 = scmp.lt.s32.totalorder %s810_s11, %s470_s7 }
  0x4c   : > { %p477_p8 = por %p476_p6, %p475_p5 }
  0x4e   : > { %p478_p10 = pnand %p477_p8, %p471_p4 }
  0x50   : > { %481 = shalt.err (!%p478_p10)  }
  0x51   : > { %79 = dma.hbm_to_vmem [thread:$0]  %s72_s28, 32, %s790_s9, [#allocation3 + $0x1], %s703_s12, %s703_s12, %s704_s13 }
  0x52   : > { %s354_s19 = sshll.u32 %s82_s3, 4  ;;  %s95_s22 = sadd.s32 3, %s778_s29 }
  0x53   : > { %s85_s27 = sadd.s32 %s354_s19, %s83_s25  ;;  %s842_s16 = sld [smem:[#allocation5 + %s95_s22]] }
  0x54   : > { %s355_s0 = sshll.u32 %s85_s27, 4  ;;  %s706_s18 = smov [#allocation2 + $0x3]  }
  0x55   : > { %s87_s17 = scalar_lea.hbm %s1008_s1, %s355_s0  ;;  %s106_s24 = sshll.u32 %s706_s18, 4  ;;  %s860_s24 = int_to_ptr.vmem [resolvable:$true] %s106_s24 }
  0x56   : > { %s482_s4 = scalar_lea.hbm %s87_s17, 32  ;;  %p485_p12 = scmp.lt.u32.totalorder %s87_s17, %s1008_s1 }
  0x57   : > { %p483_p11 = scmp.ne.s32.totalorder %s87_s17, %s482_s4  ;;  %p486_p13 = scmp.lt.u32.totalorder %s801_s6, %s482_s4 }
  0x58   : > { %p488_p1 = scmp.lt.u32.totalorder %s482_s4, %s87_s17 }
  0x59   : > { %p487_p0 = por %p486_p13, %p485_p12 }
  0x5b   : > { %p489_p2 = por %p488_p1, %p487_p0 }
  0x5d   : > { %p490_p3 = pnand %p489_p2, %p483_p11 }
  0x5f   : > { %493 = shalt.err (!%p490_p3)  }
  0x60   : > { %s494_s25 = scalar_lea.vmem %s821_s23, 32  ;;  %p499_p5 = scmp.lt.s32.totalorder %s821_s23, %s785_s5 }
  0x61   : > { %p495_p4 = scmp.ne.s32.totalorder %s821_s23, %s494_s25  ;;  %p500_p6 = scmp.lt.s32.totalorder %s810_s11, %s494_s25 }
  0x63   : > { %p501_p8 = por %p500_p6, %p499_p5 }
  0x65   : > { %p502_p10 = pnand %p501_p8, %p495_p4 }
  0x67   : > { %505 = shalt.err (!%p502_p10)  }
  0x68   : > { %94 = dma.hbm_to_vmem [thread:$0]  %s87_s17, 32, %s821_s23, [#allocation3 + $0x2], %s703_s12, %s703_s12, %s704_s13 }
  0x69   : > { %s110_s28 = sadd.s32 4, %s778_s29  ;;  %s97_s3 = sshrl.u32 %s842_s16, 3 }
  0x6a   : > { %s863_s9 = sld [smem:[#allocation5 + %s110_s28]]  ;;  %s98_s7 = sand.u32 7, %s842_s16  }
  0x6b   : > { %s356_s19 = sshll.u32 %s97_s3, 4  ;;  %s707_s22 = smov [#allocation2 + $0x4]  }
  0x6c   : > { %s121_s27 = sshll.u32 %s707_s22, 4  ;;  %s100_s0 = sadd.s32 %s356_s19, %s98_s7  ;;  %s867_s27 = int_to_ptr.vmem [resolvable:$true] %s121_s27 }
  0x6d   : > { %s357_s14 = sshll.u32 %s100_s0, 4  ;;  %s125_s15 = sadd.s32 5, %s778_s29 }
  0x6e   : > { %s102_s23 = scalar_lea.hbm %s1008_s1, %s357_s14  ;;  %s873_s17 = sld [smem:[#allocation5 + %s125_s15]] }
  0x6f   : > { %s506_s8 = scalar_lea.hbm %s102_s23, 32  ;;  %p509_p12 = scmp.lt.u32.totalorder %s102_s23, %s1008_s1 }
  0x70   : > { %p507_p11 = scmp.ne.s32.totalorder %s102_s23, %s506_s8  ;;  %p510_p13 = scmp.lt.u32.totalorder %s801_s6, %s506_s8 }
  0x71   : > { %p512_p1 = scmp.lt.u32.totalorder %s506_s8, %s102_s23 }
  0x72   : > { %p511_p0 = por %p510_p13, %p509_p12 }
  0x74   : > { %p513_p2 = por %p512_p1, %p511_p0 }
  0x76   : > { %p514_p3 = pnand %p513_p2, %p507_p11 }
  0x78   : > { %517 = shalt.err (!%p514_p3)  }
  0x79   : > { %s518_s16 = scalar_lea.vmem %s860_s24, 32  ;;  %p523_p5 = scmp.lt.s32.totalorder %s860_s24, %s785_s5 }
  0x7a   : > { %p519_p4 = scmp.ne.s32.totalorder %s860_s24, %s518_s16  ;;  %p524_p6 = scmp.lt.s32.totalorder %s810_s11, %s518_s16 }
  0x7c   : > { %p525_p8 = por %p524_p6, %p523_p5 }
  0x7e   : > { %p526_p10 = pnand %p525_p8, %p519_p4 }
  0x80   : > { %529 = shalt.err (!%p526_p10)  }
  0x81   : > { %109 = dma.hbm_to_vmem [thread:$0]  %s102_s23, 32, %s860_s24, [#allocation3 + $0x3], %s703_s12, %s703_s12, %s704_s13 }
  0x82   : > { %s112_s28 = sshrl.u32 %s863_s9, 3  ;;  %s113_s3 = sand.u32 7, %s863_s9  }
  0x83   : > { %s358_s7 = sshll.u32 %s112_s28, 4  ;;  %s708_s22 = smov [#allocation2 + $0x5]  }
  0x84   : > { %s115_s19 = sadd.s32 %s358_s7, %s113_s3  ;;  %s136_s0 = sshll.u32 %s708_s22, 4  ;;  %s890_s0 = int_to_ptr.vmem [resolvable:$true] %s136_s0 }
  0x85   : > { %s359_s14 = sshll.u32 %s115_s19, 4  ;;  %s127_s8 = sshrl.u32 %s873_s17, 3 }
  0x86   : > { %s117_s4 = scalar_lea.hbm %s1008_s1, %s359_s14 }
  0x87   : > { %s530_s10 = scalar_lea.hbm %s117_s4, 32  ;;  %p533_p12 = scmp.lt.u32.totalorder %s117_s4, %s1008_s1 }
  0x88   : > { %p531_p11 = scmp.ne.s32.totalorder %s117_s4, %s530_s10  ;;  %p534_p13 = scmp.lt.u32.totalorder %s801_s6, %s530_s10 }
  0x89   : > { %p536_p1 = scmp.lt.u32.totalorder %s530_s10, %s117_s4 }
  0x8a   : > { %p535_p0 = por %p534_p13, %p533_p12 }
  0x8c   : > { %p537_p2 = por %p536_p1, %p535_p0 }
  0x8e   : > { %p538_p3 = pnand %p537_p2, %p531_p11 }
  0x90   : > { %541 = shalt.err (!%p538_p3)  }
  0x91   : > { %s542_s24 = scalar_lea.vmem %s867_s27, 32  ;;  %p547_p5 = scmp.lt.s32.totalorder %s867_s27, %s785_s5 }
  0x92   : > { %p543_p4 = scmp.ne.s32.totalorder %s867_s27, %s542_s24  ;;  %p548_p6 = scmp.lt.s32.totalorder %s810_s11, %s542_s24 }
  0x94   : > { %p549_p8 = por %p548_p6, %p547_p5 }
  0x96   : > { %p550_p10 = pnand %p549_p8, %p543_p4 }
  0x98   : > { %553 = shalt.err (!%p550_p10)  }
  0x99   : > { %124 = dma.hbm_to_vmem [thread:$0]  %s117_s4, 32, %s867_s27, [#allocation3 + $0x4], %s703_s12, %s703_s12, %s704_s13 }
  0x9a   : > { %s128_s9 = sand.u32 7, %s873_s17   ;;  %s360_s23 = sshll.u32 %s127_s8, 4 }
  0x9b   : > { %s130_s28 = sadd.s32 %s360_s23, %s128_s9  ;;  %s140_s3 = sadd.s32 6, %s778_s29 }
  0x9c   : > { %s361_s7 = sshll.u32 %s130_s28, 4  ;;  %s141_s19 = sld [smem:[#allocation5 + %s140_s3]] }
  0x9d   : > { %s132_s15 = scalar_lea.hbm %s1008_s1, %s361_s7 }
  0x9e   : > { %s554_s18 = scalar_lea.hbm %s132_s15, 32  ;;  %p557_p12 = scmp.lt.u32.totalorder %s132_s15, %s1008_s1 }
  0x9f   : > { %p555_p11 = scmp.ne.s32.totalorder %s132_s15, %s554_s18  ;;  %p558_p13 = scmp.lt.u32.totalorder %s801_s6, %s554_s18 }
  0xa0   : > { %p560_p1 = scmp.lt.u32.totalorder %s554_s18, %s132_s15 }
  0xa1   : > { %p559_p0 = por %p558_p13, %p557_p12 }
  0xa3   : > { %p561_p2 = por %p560_p1, %p559_p0 }
  0xa5   : > { %p562_p3 = pnand %p561_p2, %p555_p11 }
  0xa7   : > { %565 = shalt.err (!%p562_p3)  }
  0xa8   : > { %s566_s27 = scalar_lea.vmem %s890_s0, 32  ;;  %p571_p5 = scmp.lt.s32.totalorder %s890_s0, %s785_s5 }
  0xa9   : > { %p567_p4 = scmp.ne.s32.totalorder %s890_s0, %s566_s27  ;;  %p572_p6 = scmp.lt.s32.totalorder %s810_s11, %s566_s27 }
  0xab   : > { %p573_p8 = por %p572_p6, %p571_p5 }
  0xad   : > { %p574_p10 = pnand %p573_p8, %p567_p4 }
  0xaf   : > { %577 = shalt.err (!%p574_p10)  }
  0xb0   : > { %139 = dma.hbm_to_vmem [thread:$0]  %s132_s15, 32, %s890_s0, [#allocation3 + $0x5], %s703_s12, %s703_s12, %s704_s13 }
  0xb1   : > { %s155_s17 = sadd.s32 7, %s778_s29  ;;  %s709_s8 = smov [#allocation2 + $0x6]  }
  0xb2   : > { %s928_s4 = sld [smem:[#allocation5 + %s155_s17]]  ;;  %s151_s16 = sshll.u32 %s709_s8, 4  ;;  %s152_s16 = int_to_ptr.vmem [resolvable:$true] %s151_s16 }
  0xb3   : > { %s142_s24 = sshrl.u32 %s141_s19, 3  ;;  %s143_s9 = sand.u32 7, %s141_s19  }
  0xb4   : > { %s362_s23 = sshll.u32 %s142_s24, 4  ;;  %s710_s7 = smov [#allocation2 + $0x7]  }
  0xb5   : > { %s145_s28 = sadd.s32 %s362_s23, %s143_s9  ;;  %s166_s22 = sshll.u32 %s710_s7, 4  ;;  %s167_s22 = int_to_ptr.vmem [resolvable:$true] %s166_s22 }
  0xb6   : > { %s363_s3 = sshll.u32 %s145_s28, 4 }
  0xb7   : > { %s147_s10 = scalar_lea.hbm %s1008_s1, %s363_s3 }
  0xb8   : > { %s157_s0 = sshrl.u32 %s928_s4, 3  ;;  %s578_s29 = scalar_lea.hbm %s147_s10, 32 }
  0xb9   : > { %p579_p11 = scmp.ne.s32.totalorder %s147_s10, %s578_s29  ;;  %p581_p12 = scmp.lt.u32.totalorder %s147_s10, %s1008_s1 }
  0xba   : > { %p582_p13 = scmp.lt.u32.totalorder %s801_s6, %s578_s29  ;;  %p584_p1 = scmp.lt.u32.totalorder %s578_s29, %s147_s10 }
  0xbc   : > { %p583_p0 = por %p582_p13, %p581_p12 }
  0xbe   : > { %p585_p2 = por %p584_p1, %p583_p0 }
  0xc0   : > { %p586_p3 = pnand %p585_p2, %p579_p11 }
  0xc2   : > { %589 = shalt.err (!%p586_p3)  }
  0xc3   : > { %s590_s19 = scalar_lea.vmem %s152_s16, 32  ;;  %p595_p5 = scmp.lt.s32.totalorder %s152_s16, %s785_s5 }
  0xc4   : > { %p591_p4 = scmp.ne.s32.totalorder %s152_s16, %s590_s19  ;;  %p596_p6 = scmp.lt.s32.totalorder %s810_s11, %s590_s19 }
  0xc6   : > { %p597_p8 = por %p596_p6, %p595_p5 }
  0xc8   : > { %p598_p10 = pnand %p597_p8, %p591_p4 }
  0xca   : > { %601 = shalt.err (!%p598_p10)  }
  0xcb   : > { %154 = dma.hbm_to_vmem [thread:$0]  %s147_s10, 32, %s152_s16, [#allocation3 + $0x6], %s703_s12, %s703_s12, %s704_s13 }
  0xcc   : > { %s158_s27 = sand.u32 7, %s928_s4   ;;  %s364_s17 = sshll.u32 %s157_s0, 4 }
  0xcd   : > { %s160_s8 = sadd.s32 %s364_s17, %s158_s27 }
  0xce   : > { %s365_s24 = sshll.u32 %s160_s8, 4 }
  0xcf   : > { %s162_s28 = scalar_lea.hbm %s1008_s1, %s365_s24 }
  0xd0   : > { %s602_s3 = scalar_lea.hbm %s162_s28, 32  ;;  %p605_p12 = scmp.lt.u32.totalorder %s162_s28, %s1008_s1 }
  0xd1   : > { %p603_p11 = scmp.ne.s32.totalorder %s162_s28, %s602_s3  ;;  %p606_p13 = scmp.lt.u32.totalorder %s801_s6, %s602_s3 }
  0xd2   : > { %p608_p1 = scmp.lt.u32.totalorder %s602_s3, %s162_s28 }
  0xd3   : > { %p607_p0 = por %p606_p13, %p605_p12 }
  0xd5   : > { %p609_p2 = por %p608_p1, %p607_p0 }
  0xd7   : > { %p610_p3 = pnand %p609_p2, %p603_p11 }
  0xd9   : > { %613 = shalt.err (!%p610_p3)  }
  0xda   : > { %s614_s4 = scalar_lea.vmem %s167_s22, 32  ;;  %p619_p5 = scmp.lt.s32.totalorder %s167_s22, %s785_s5 }
  0xdb   : > { %p615_p4 = scmp.ne.s32.totalorder %s167_s22, %s614_s4  ;;  %p620_p6 = scmp.lt.s32.totalorder %s810_s11, %s614_s4 }
  0xdd   : > { %p621_p8 = por %p620_p6, %p619_p5 }
  0xdf   : > { %p622_p10 = pnand %p621_p8, %p615_p4 }
  0xe1   : > { %625 = shalt.err (!%p622_p10)  }
  0xe2   : > { %169 = dma.hbm_to_vmem [thread:$0]  %s162_s28, 32, %s167_s22, [#allocation3 + $0x7], %s703_s12, %s703_s12, %s704_s13 }
  0xe3   : > { %s957_s6 = scalar_lea.vmem [#allocation6], %s782_s30 }
  0xe4   : > { %668 = dma.done.wait [#allocation3], 32 }
  0xe5   : > { %669 = vsyncadd [#allocation3], 4294967264 }
  0xe6   : > { %670 = dma.done.wait [#allocation3 + $0x1], 32 }
  0xe7   : > { %671 = vsyncadd [#allocation3 + $0x1], 4294967264 }
  0xe8   : > { %672 = dma.done.wait [#allocation3 + $0x2], 32 }
  0xe9   : > { %673 = vsyncadd [#allocation3 + $0x2], 4294967264 }
  0xea   : > { %674 = dma.done.wait [#allocation3 + $0x3], 32 }
  0xeb   : > { %675 = vsyncadd [#allocation3 + $0x3], 4294967264 }
  0xec   : > { %676 = dma.done.wait [#allocation3 + $0x4], 32 }
  0xed   : > { %677 = vsyncadd [#allocation3 + $0x4], 4294967264 }
  0xee   : > { %678 = dma.done.wait [#allocation3 + $0x5], 32 }
  0xef   : > { %679 = vsyncadd [#allocation3 + $0x5], 4294967264 }
  0xf0   : > { %680 = dma.done.wait [#allocation3 + $0x6], 32 }
  0xf1   : > { %681 = vsyncadd [#allocation3 + $0x6], 4294967264 }
  0xf2   : > { %682 = dma.done.wait [#allocation3 + $0x7], 32 }
  0xf3   : > { %683 = vsyncadd [#allocation3 + $0x7], 4294967264  ;;  %v187_v0 = vld [vmem:[#allocation2] sm:$0xff]  ;;  %v188_v1 = vld [vmem:[#allocation2 + $0x8] sm:$0xff]  ;;  %s379_s30 = sshll.u32 %s698_s21, 8  ;;  %s215_s5 = sshll.u32 %s957_s6, 4  ;;  %s966_s5 = int_to_ptr.vmem [resolvable:$true] %s215_s5 }
  0xf4   : > { %v189_v2 = vmul.f32 %v187_v0, %v187_v0  ;;  %v190_v3 = vmul.f32 %v188_v1, %v188_v1  ;;  %s964_s13 = scalar_lea.hbm %s1009_s2, %s379_s30  ;;  %s1021_s16 = sand.u32 1, %s694_s20  }
  0xf5   : > { %s201_s22 = scalar_lea.sflag [#allocation7], %s1021_s16  ;;  %s626_s18 = scalar_lea.vmem %s966_s5, 256 }
  0xf6   : > { %v191_v4 = vadd.f32 %v190_v3, %v189_v2  ;;  %p627_p11 = scmp.ne.s32.totalorder %s966_s5, %s626_s18  ;;  %s711_s10 = smov [#allocation6]  }
  0xf7   : > { %s630_s0 = sshll.u32 %s711_s10, 4  ;;  %s631_s0 = int_to_ptr.vmem [resolvable:$false] %s630_s0 }
  0xf8   : > { %192 = vadd.xlane.f32.xlu0 %v191_v4  ;;  %p628_p12 = pnand %p627_p11, %p767_p7  ;;  %s632_s29 = scalar_lea.vmem %s631_s0, 512 }
  0xf9   : > { %p633_p0 = scmp.lt.s32.totalorder %s966_s5, %s631_s0  ;;  %p634_p1 = scmp.lt.s32.totalorder %s632_s29, %s626_s18 }
  0xfa   : > { %p629_p13 = pneg %p628_p12 }
  0xfb   : > { %p635_p2 = por %p634_p1, %p633_p0 }
  0xfd   : > { %p636_p3 = pnand %p635_p2, %p629_p13 }
 0x185   : > { %v193_v5 = vpop.xlane.xlu0 %192 }
 0x186   : > { %v194_v6 = vmax.f32 %v193_v5, 1e-24 }
 0x188   : > { %422 = vrsqrt.f32 %v194_v6 }
 0x192   : > { %v423_v7 = vpop.eup %422 }
 0x193   : > { %v196_v8 = vmul.f32 %v423_v7, %v187_v0  ;;  %v197_v9 = vmul.f32 %v423_v7, %v188_v1 }
 0x195   : > { %198 = vst [vmem:[%s957_s6] sm:$0xff] %v196_v8  ;;  %199 = vst [vmem:[%s957_s6 + $0x8] sm:$0xff] %v197_v9 }
 0x196   : > { %639 = shalt.err (!%p636_p3)
}
 0x197   : > { %s640_s15 = scalar_lea.hbm %s964_s13, 256  ;;  %s644_s27 = scalar_lea.hbm %s1009_s2, 512 }
 0x198   : > { %p641_p4 = scmp.ne.s32.totalorder %s964_s13, %s640_s15  ;;  %p645_p8 = scmp.lt.u32.totalorder %s964_s13, %s1009_s2 }
 0x199   : > { %p646_p10 = scmp.lt.u32.totalorder %s644_s27, %s640_s15  ;;  %p648_p12 = scmp.lt.u32.totalorder %s640_s15, %s964_s13 }
 0x19a   : > { %p642_p5 = pnand %p641_p4, %p767_p7 }
 0x19b   : > { %p647_p11 = por %p646_p10, %p645_p8 }
 0x19c   : > { %p643_p6 = pneg %p642_p5 }
 0x19d   : > { %p649_p13 = por %p648_p12, %p647_p11 }
 0x19f   : > { %p650_p0 = pnand %p649_p13, %p643_p6 }
 0x1a1   : > { %653 = shalt.err (!%p650_p0)
}
 0x1a2   : > { %380 = dma.vmem_to_hbm [thread:$0]  (%p767_p7), %s966_s5, 256, %s964_s13, %s201_s22  }
 0x1a3 PF: > { %s1022_s24 = sld [smem:[#allocation26_spill]]  ;;  %p386_p1 = scmp.ge.s32.totalorder %s698_s21, 1 }
 0x1a5   : > { %p383_p2 = pnand %p386_p1, %p771_p9 }
 0x1a9   : > { %s227_s23 = sand.u32 1, %s1022_s24  }
 0x1aa   : > { %s228_s28 = scalar_lea.sflag [#allocation7], %s227_s23 }
 0x1ab   : > { %685 = dma.done.wait (!%p383_p2), %s228_s28, 256  }
 0x1ac   : > { %687 = vsyncadd (!%p383_p2), %s228_s28, 4294967040  ;;  %s1024_s21 = sld [smem:[#allocation27_spill]]  ;;  %s1025_s3 = sld [smem:[#allocation28_spill]] }
 0x1ad   : > { %s1026_s19 = smov %s694_s20 }
 0x1b2   : > { %p16_p3 = scmp.ge.s32.totalorder %s1024_s21, 3   ;;  %s1027_s20 = smov %s1025_s3 }
 0x1b4   :  { %18 = sbr.rel (!%p16_p3) target bundleno = 15 (0xf), region = 73 }
 0x1bb   :  { %233 = vsyncpa [#allocation7], 1 }
 0x1bc   :  { %235 = vsyncpa [#allocation7 + $0x1], 1 }
 0x1bd   :  { %236 = vsyncmov [#allocation3] }
 0x1c0   :  { %s237_s26 = vpop.sfrf %236 }
 0x1c1   :  { %p371_p7 = scmp.ne.s32.totalorder %s237_s26, 0 }
 0x1c3   :  { %241 = shalt.err (%p371_p7)  }
 0x1c4   :  { %243 = vsyncmov [#allocation3 + $0x1] }
 0x1c7   :  { %s244_s7 = vpop.sfrf %243 }
 0x1c8   :  { %p372_p9 = scmp.ne.s32.totalorder %s244_s7, 0 }
 0x1ca   :  { %248 = shalt.err (%p372_p9)  }
 0x1cb   :  { %250 = vsyncmov [#allocation3 + $0x2] }
 0x1ce   :  { %s251_s14 = vpop.sfrf %250 }
 0x1cf   :  { %p373_p4 = scmp.ne.s32.totalorder %s251_s14, 0 }
 0x1d1   :  { %255 = shalt.err (%p373_p4)  }
 0x1d2   :  { %257 = vsyncmov [#allocation3 + $0x3] }
 0x1d5   :  { %s258_s4 = vpop.sfrf %257 }
 0x1d6   :  { %p374_p5 = scmp.ne.s32.totalorder %s258_s4, 0 }
 0x1d8   :  { %262 = shalt.err (%p374_p5)  }
 0x1d9   :  { %264 = vsyncmov [#allocation3 + $0x4] }
 0x1dc   :  { %s265_s21 = vpop.sfrf %264 }
 0x1dd   :  { %p375_p6 = scmp.ne.s32.totalorder %s265_s21, 0 }
 0x1df   :  { %269 = shalt.err (%p375_p6)  }
 0x1e0   :  { %271 = vsyncmov [#allocation3 + $0x5] }
 0x1e3   :  { %s272_s1 = vpop.sfrf %271 }
 0x1e4   :  { %p376_p8 = scmp.ne.s32.totalorder %s272_s1, 0 }
 0x1e6   :  { %276 = shalt.err (%p376_p8)  }
 0x1e7   :  { %278 = vsyncmov [#allocation3 + $0x6] }
 0x1ea   :  { %s279_s2 = vpop.sfrf %278 }
 0x1eb   :  { %p377_p10 = scmp.ne.s32.totalorder %s279_s2, 0 }
 0x1ed   :  { %283 = shalt.err (%p377_p10)  }
 0x1ee   :  { %285 = vsyncmov [#allocation3 + $0x7] }
 0x1f1   :  { %s286_s20 = vpop.sfrf %285 }
 0x1f2   :  { %p378_p11 = scmp.ne.s32.totalorder %s286_s20, 0 }
 0x1f4   :  { %290 = shalt.err (%p378_p11)  }

</bundles_post_ra>
